<compile_context>
chip_gen: v7x
topology: tpu7x:2x2x1
jax: 0.10.0
libtpu: 0.0.40
codegen_flags: <defaults>
</compile_context>

<pallas_src>
import functools

import jax
import jax.numpy as jnp
from jax import lax
from jax.experimental import pallas as pl
from jax.experimental.pallas import tpu as pltpu


def _gt_kernel(x_ref, mc_ref, mud_ref, o_ref, *, rows_per_batch, lanes_per_ts):
    """Whole-problem kernel (no grid).

    x_ref:   VMEM [R, L]  lane-dense input (L = 128 here)
    mc_ref:  VMEM [L, L]  intra-row matrix: gconv scale + identity +
                          (I + centre tap) + intra-row prev/next taps
    mud_ref: VMEM [L, L]  cross-row matrix: prev-row last-slot tap (Wp) into
                          out slot 0, next-row first-slot tap (Wn) into out
                          slot tpr-1
    o_ref:   VMEM [R, L]  lane-dense output
    """
    x = x_ref[...].astype(jnp.float32)                     # [R, L]
    R, L = x.shape

    row = lax.broadcasted_iota(jnp.int32, (R, L), 0)
    lane = lax.broadcasted_iota(jnp.int32, (R, L), 1)
    rb = row % rows_per_batch                              # row index within batch

    xp = pltpu.roll(x, 1, axis=0)                          # xp[r] = x[r-1]
    xn = pltpu.roll(x, R - 1, axis=0)                      # xn[r] = x[r+1]

    # Combined cross-row operand:
    #   slot-0 lanes        <- next row's slot-0 data (feeds Wn into out slot tpr-1)
    #   slot-(tpr-1) lanes  <- prev row's slot-(tpr-1) data (feeds Wp into out slot 0)
    # Rows at a batch's first/last row are zeroed: that is both the conv zero
    # padding at t==0 / t==T-1 and the cross-batch wraparound kill.
    need_next = (lane < lanes_per_ts) & (rb != rows_per_batch - 1)
    need_prev = (lane >= L - lanes_per_ts) & (rb != 0)
    x_b = jnp.where(need_next, xn,
                    jnp.where(need_prev, xp, jnp.zeros_like(x)))

    out = jnp.dot(x, mc_ref[...],
                  preferred_element_type=jnp.float32,
                  precision=jax.lax.Precision.HIGHEST)
    out = out + jnp.dot(x_b, mud_ref[...],
                        preferred_element_type=jnp.float32,
                        precision=jax.lax.Precision.HIGHEST)
    o_ref[...] = out.astype(o_ref.dtype)                   # one unmasked dense store


def gt_module_pallas(x, A, W_torch):
    """x: [B, T, C]; A: [V, V]; W_torch: [Cq, Cq, 3, 1] (torch OIHW layout)."""
    B, T, C = x.shape
    Cq, Ch = C // 4, C // 2
    V = A.shape[0]
    f32 = jnp.float32

    assert C % 4 == 0
    assert 128 % C == 0, "lane-dense path needs C to divide 128"
    tpr = 128 // C                          # timesteps per 128-lane row
    assert tpr >= 2, "TODO(synk): C == 128 needs separate prev/next matrices"
    assert T % tpr == 0, "lane-dense path needs T % (128 // C) == 0"
    rpb = T // tpr                          # rows per batch
    R = B * rpb
    L = tpr * C                             # == 128

    A = A.astype(f32)
    W = W_torch.astype(f32)

    # SimpleGConv collapses to a scalar (size-1 'u' broadcast + mean over 'v').
    scale = 1.0 + jnp.sum(A) / V

    # Per-tap channel-mixing matrices oriented for row-vector matmul (x @ M).
    # Conv2d with padding 1: tap k=0 acts on x[t-1], k=1 on x[t], k=2 on x[t+1].
    Wp = W[:, :, 0, 0].T                    # [ci, co]
    Wc = W[:, :, 1, 0].T
    Wn = W[:, :, 2, 0].T

    tc0 = Cq + Ch                           # first tconv channel
    # Same-timestep C x C block: gconv scale, identity channels, tconv
    # residual (the 1.0 diag) + centre tap — residual folded into the weight.
    diag = jnp.concatenate([scale * jnp.ones((Cq,), f32),
                            jnp.ones((Ch + Cq,), f32)])
    blk_c = jnp.diag(diag).at[tc0:, tc0:].add(Wc)
    blk_p = jnp.zeros((C, C), f32).at[tc0:, tc0:].set(Wp)
    blk_n = jnp.zeros((C, C), f32).at[tc0:, tc0:].set(Wn)

    # Intra-row matrix: block tri-diagonal over the tpr timestep slots.
    m_c = jnp.zeros((L, L), f32)
    for j in range(tpr):
        m_c = m_c.at[j * C:(j + 1) * C, j * C:(j + 1) * C].set(blk_c)
        if j >= 1:
            m_c = m_c.at[(j - 1) * C:j * C, j * C:(j + 1) * C].set(blk_p)
        if j + 1 < tpr:
            m_c = m_c.at[(j + 1) * C:(j + 2) * C, j * C:(j + 1) * C].set(blk_n)

    # Cross-row matrix: prev row slot (tpr-1) -> out slot 0 (Wp tap),
    # next row slot 0 -> out slot (tpr-1) (Wn tap).  Source lane ranges are
    # disjoint, so one matrix on one combined rolled operand suffices.
    m_ud = jnp.zeros((L, L), f32)
    m_ud = m_ud.at[(tpr - 1) * C:, :C].set(blk_p)
    m_ud = m_ud.at[:C, (tpr - 1) * C:].set(blk_n)

    x_dense = x.reshape(R, L)               # free: [B,T,C] is contiguous

    kernel = functools.partial(_gt_kernel, rows_per_batch=rpb, lanes_per_ts=C)
    out_dense = pl.pallas_call(
        kernel,
        out_shape=jax.ShapeDtypeStruct((R, L), x.dtype),
        in_specs=[
            pl.BlockSpec(memory_space=pltpu.MemorySpace.VMEM),   # x_dense
            pl.BlockSpec(memory_space=pltpu.MemorySpace.VMEM),   # m_c
            pl.BlockSpec(memory_space=pltpu.MemorySpace.VMEM),   # m_ud
        ],
        out_specs=pl.BlockSpec(memory_space=pltpu.MemorySpace.VMEM),
    )(x_dense, m_c, m_ud)

    return out_dense.reshape(B, T, C)


def gt_module_reference(x, A, W_torch):
    """Pure-JAX replica of the torch forward (W_torch: [co, ci, 3, 1])."""
    B, T, C = x.shape
    Cq, Ch = C // 4, C // 2
    V = A.shape[0]
    hi = jax.lax.Precision.HIGHEST

    x4 = jnp.transpose(x, (0, 2, 1))[..., None]             # [B, C, T, 1]
    xg, xc, xt = x4[:, :Cq], x4[:, Cq:Cq + Ch], x4[:, Cq + Ch:]

    # gconv: torch einsum broadcasts the size-1 'u' dim against A's rows,
    # then mean over 'v', + residual.
    z = jnp.einsum('bctu,uv->bctv',
                   jnp.broadcast_to(xg, xg.shape[:3] + (V,)), A, precision=hi)
    out_g = z.mean(axis=3, keepdims=True) + xg

    # tconv: Conv2d (3,1), pad (1,0), no bias, + residual.
    conv = lax.conv_general_dilated(
        xt, W_torch, window_strides=(1, 1), padding=[(1, 1), (0, 0)],
        dimension_numbers=("NCHW", "OIHW", "NCHW"), precision=hi)
    out_t = conv + xt

    cat = jnp.concatenate([out_g, xc, out_t], axis=1)        # [B, C, T, 1]
    return jnp.transpose(cat[..., 0], (0, 2, 1))              # [B, T, C]


if __name__ == "__main__":
    # Module-consistent small shapes: d_model=32, num_joints=4, B=2, T=16.
    B, T, d_model, num_joints = 2, 16, 32, 4
    C = d_model
    Cq = d_model // 4
    V = 2 * num_joints

    key = jax.random.PRNGKey(0)
    kx, ka, kw = jax.random.split(key, 3)

    x = jax.random.normal(kx, (B, T, C), dtype=jnp.float32)
    # SimpleGConv.A: trunc_normal_(std=0.02) -> deterministic clipped normal
    A = jnp.clip(0.02 * jax.random.normal(ka, (V, V), dtype=jnp.float32),
                 -0.04, 0.04)
    # SimpleTConv conv weight, torch layout [co, ci, 3, 1]
    W_torch = 0.1 * jax.random.normal(kw, (Cq, Cq, 3, 1), dtype=jnp.float32)

    out = jax.block_until_ready(gt_module_pallas(x, A, W_torch))
    ref = gt_module_reference(x, A, W_torch)

    assert out.shape == (B, T, C)
    assert jnp.allclose(out, ref, atol=1e-5, rtol=1e-5), \
        float(jnp.max(jnp.abs(out - ref)))

    print("KERNEL_OK")
</pallas_src>

<mosaic_0001>
module attributes {stable_mosaic.version = 11 : i64} {
  func.func @_gt_kernel(%arg0: memref<8x128xf32, #tpu.memory_space<vmem>>, %arg1: memref<128x128xf32, #tpu.memory_space<vmem>>, %arg2: memref<128x128xf32, #tpu.memory_space<vmem>>, %arg3: memref<8x128xf32, #tpu.memory_space<vmem>>) attributes {dimension_semantics = [], scalar_prefetch = 0 : i64, scratch_operands = 0 : i64, tpu.core_type = #tpu.core_type<tc>} {
    %c0 = arith.constant 0 : index
    %c0_0 = arith.constant 0 : index
    %0 = vector.load %arg0[%c0, %c0_0] : memref<8x128xf32, #tpu.memory_space<vmem>>, vector<8x128xf32>
    %1 = tpu.iota {dimensions = array<i32: 0>} : vector<8x128xi32>
    %2 = tpu.iota {dimensions = array<i32: 1>} : vector<8x128xi32>
    %c4_i32 = arith.constant 4 : i32
    %c0_i32 = arith.constant 0 : i32
    %3 = arith.cmpi eq, %c4_i32, %c0_i32 : i32
    %c1_i32 = arith.constant 1 : i32
    %4 = arith.select %3, %c1_i32, %c4_i32 : i32
    %5 = vector.broadcast %4 : i32 to vector<8x128xi32>
    %6 = arith.remsi %1, %5 : vector<8x128xi32>
    %c0_i32_1 = arith.constant 0 : i32
    %7 = vector.broadcast %c0_i32_1 : i32 to vector<8x128xi32>
    %8 = arith.cmpi ne, %6, %7 : vector<8x128xi32>
    %c0_i32_2 = arith.constant 0 : i32
    %9 = vector.broadcast %c0_i32_2 : i32 to vector<8x128xi32>
    %10 = arith.cmpi slt, %6, %9 : vector<8x128xi32>
    %c0_i32_3 = arith.constant 0 : i32
    %11 = arith.cmpi slt, %4, %c0_i32_3 : i32
    %12 = vector.broadcast %11 : i1 to vector<8x128xi1>
    %13 = vector.broadcast %12 : vector<8x128xi1> to vector<8x128xi1>
    %14 = arith.xori %10, %13 : vector<8x128xi1>
    %15 = arith.andi %14, %8 : vector<8x128xi1>
    %16 = vector.broadcast %4 : i32 to vector<8x128xi32>
    %17 = arith.addi %6, %16 : vector<8x128xi32>
    %18 = arith.select %15, %17, %6 : vector<8x128xi1>, vector<8x128xi32>
    %c1_i32_4 = arith.constant 1 : i32
    %19 = tpu.dynamic_rotate %0 by %c1_i32_4 dim 0 : vector<8x128xf32>, i32 -> vector<8x128xf32>
    %c7_i32 = arith.constant 7 : i32
    %20 = tpu.dynamic_rotate %0 by %c7_i32 dim 0 : vector<8x128xf32>, i32 -> vector<8x128xf32>
    %c32_i32 = arith.constant 32 : i32
    %21 = vector.broadcast %c32_i32 : i32 to vector<8x128xi32>
    %22 = arith.cmpi slt, %2, %21 : vector<8x128xi32>
    %c3_i32 = arith.constant 3 : i32
    %23 = vector.broadcast %c3_i32 : i32 to vector<8x128xi32>
    %24 = arith.cmpi ne, %18, %23 : vector<8x128xi32>
    %25 = arith.andi %22, %24 : vector<8x128xi1>
    %c96_i32 = arith.constant 96 : i32
    %26 = vector.broadcast %c96_i32 : i32 to vector<8x128xi32>
    %27 = arith.cmpi sge, %2, %26 : vector<8x128xi32>
    %c0_i32_5 = arith.constant 0 : i32
    %28 = vector.broadcast %c0_i32_5 : i32 to vector<8x128xi32>
    %29 = arith.cmpi ne, %18, %28 : vector<8x128xi32>
    %30 = arith.andi %27, %29 : vector<8x128xi1>
    %cst = arith.constant 0.000000e+00 : f32
    %31 = vector.broadcast %cst : f32 to vector<8x128xf32>
    %32 = arith.select %30, %19, %31 : vector<8x128xi1>, vector<8x128xf32>
    %33 = arith.select %25, %20, %32 : vector<8x128xi1>, vector<8x128xf32>
    %c0_6 = arith.constant 0 : index
    %c0_7 = arith.constant 0 : index
    %34 = vector.load %arg1[%c0_6, %c0_7] : memref<128x128xf32, #tpu.memory_space<vmem>>, vector<128x128xf32>
    %cst_8 = arith.constant dense<0.000000e+00> : vector<8x128xf32>
    %35 = tpu.matmul %0, %34, %cst_8 {dimension_numbers = #tpu.dot_dimension_numbers<[1], [0], [0], [1], [0, 0, 1, 1], [], []>, precision = #tpu.contract_precision<fp32>} : vector<8x128xf32>, vector<128x128xf32>, vector<8x128xf32> -> vector<8x128xf32>
    %c0_9 = arith.constant 0 : index
    %c0_10 = arith.constant 0 : index
    %36 = vector.load %arg2[%c0_9, %c0_10] : memref<128x128xf32, #tpu.memory_space<vmem>>, vector<128x128xf32>
    %cst_11 = arith.constant dense<0.000000e+00> : vector<8x128xf32>
    %37 = tpu.matmul %33, %36, %cst_11 {dimension_numbers = #tpu.dot_dimension_numbers<[1], [0], [0], [1], [0, 0, 1, 1], [], []>, precision = #tpu.contract_precision<fp32>} : vector<8x128xf32>, vector<128x128xf32>, vector<8x128xf32> -> vector<8x128xf32>
    %38 = arith.addf %35, %37 : vector<8x128xf32>
    %c0_12 = arith.constant 0 : index
    %c0_13 = arith.constant 0 : index
    %39 = vector.load %arg3[%c0_12, %c0_13] : memref<8x128xf32, #tpu.memory_space<vmem>>, vector<8x128xf32>
    tpu.vector_store %arg3[%c0_12, %c0_13], %38 {strides = array<i32>} : memref<8x128xf32, #tpu.memory_space<vmem>>, vector<8x128xf32>,
    return
  }
}

</mosaic_0001>

<bundles_post_ra>
// kernel: tpu_custom_call.1
= control target key start
LH: loop header
LB: loop body
LE: loop exit
PB: predicated region body
PF: predicated region fallthrough
CT: control target
= control target key end

     0   :  { %8 = vsyncpa [#allocation3], 0  ;;  %s3141_s0 = inlined_call_operand.hbm [shape: f32[8,128], index: 0, kind: input, shape index: {}]   ;;  %s3142_s1 = inlined_call_operand.hbm [shape: f32[128,128], index: 1, kind: input, shape index: {}]   ;;  %s3143_s2 = inlined_call_operand.hbm [shape: f32[128,128], index: 2, kind: input, shape index: {}]   ;;  %s3144_s3 = inlined_call_operand.hbm [shape: f32[8,128], index: 3, kind: output, shape index: {}]  }
   0x1   :  { %9 = vsyncpa [#allocation6], 0 }
   0x2   :  { %10 = vsyncpa [#allocation4], 0  ;;  %s2448_s12 = smov [#allocation5]   ;;  %s2354_s16 = scalar_lea.hbm %s3142_s1, 2048 }
   0x3   :  { %s26_s13 = sshll.u32 %s2448_s12, 4  ;;  %p2355_p0 = scmp.ne.s32.totalorder %s3142_s1, %s2354_s16  ;;  %s27_s13 = int_to_ptr.vmem [resolvable:$true] %s26_s13 }
   0x4   :  { %p2358_p1 = scmp.lt.u32.totalorder %s2354_s16, %s3142_s1 }
   0x6   :  { %p2360_p2 = pnand %p2358_p1, %p2355_p0 }
   0x8   :  { %2363 = shalt.err (!%p2360_p2)
}
   0x9   :  { %s2364_s21 = scalar_lea.vmem %s27_s13, 2048  ;;  %p2369_p4 = scmp.lt.s32.totalorder %s27_s13, %s27_s13 }
   0xa   :  { %p2365_p3 = scmp.ne.s32.totalorder %s27_s13, %s2364_s21  ;;  %p2370_p5 = scmp.lt.s32.totalorder %s2364_s21, %s2364_s21 }
   0xc   :  { %p2371_p6 = por %p2370_p5, %p2369_p4 }
   0xe   :  { %p2372_p7 = pnand %p2371_p6, %p2365_p3 }
  0x10   :  { %2375 = shalt.err (!%p2372_p7)
}
  0x11   :  { %s2449_s22 = smov 128   ;;  %s2450_s23 = smov 8  }
  0x12   :  { %32 = dma.hbm_to_vmem [thread:$0]  %s3142_s1, 2048, %s27_s13, [#allocation6], %s2449_s22, %s2449_s22, %s2450_s23  }
  0x13   :  { %s2451_s26 = smov [#allocation2]   ;;  %s2452_s28 = smov [#allocation7]  }
  0x14   :  { %s17_s27 = sshll.u32 %s2451_s26, 4  ;;  %s38_s29 = sshll.u32 %s2452_s28, 4  ;;  %s18_s27 = int_to_ptr.vmem [resolvable:$true] %s17_s27  ;;  %s39_s29 = int_to_ptr.vmem [resolvable:$true] %s38_s29 }
  0x15   :  { %s2376_s5 = scalar_lea.hbm %s3141_s0, 128 }
  0x16   :  { %p2377_p8 = scmp.ne.s32.totalorder %s3141_s0, %s2376_s5  ;;  %p2380_p9 = scmp.lt.u32.totalorder %s2376_s5, %s3141_s0 }
  0x18   :  { %p2382_p10 = pnand %p2380_p9, %p2377_p8 }
  0x1a   :  { %2385 = shalt.err (!%p2382_p10)
}
  0x1b   :  { %s2386_s1 = scalar_lea.vmem %s18_s27, 128  ;;  %p2391_p12 = scmp.lt.s32.totalorder %s18_s27, %s18_s27 }
  0x1c   :  { %p2387_p11 = scmp.ne.s32.totalorder %s18_s27, %s2386_s1  ;;  %p2392_p13 = scmp.lt.s32.totalorder %s2386_s1, %s2386_s1 }
  0x1e   :  { %p2393_p0 = por %p2392_p13, %p2391_p12 }
  0x20   :  { %p2394_p1 = pnand %p2393_p0, %p2387_p11 }
  0x22   :  { %2397 = shalt.err (!%p2394_p1)
}
  0x23   :  { %20 = dma.hbm_to_vmem [thread:$0]  %s3141_s0, 128, %s18_s27, [#allocation3]  }
  0x24   :  { %s2398_s14 = scalar_lea.hbm %s3143_s2, 2048 }
  0x25   :  { %p2399_p2 = scmp.ne.s32.totalorder %s3143_s2, %s2398_s14  ;;  %p2402_p3 = scmp.lt.u32.totalorder %s2398_s14, %s3143_s2 }
  0x27   :  { %p2404_p4 = pnand %p2402_p3, %p2399_p2 }
  0x29   :  { %2407 = shalt.err (!%p2404_p4)
}
  0x2a   :  { %s2408_s19 = scalar_lea.vmem %s39_s29, 2048  ;;  %p2413_p6 = scmp.lt.s32.totalorder %s39_s29, %s39_s29 }
  0x2b   :  { %p2409_p5 = scmp.ne.s32.totalorder %s39_s29, %s2408_s19  ;;  %p2414_p7 = scmp.lt.s32.totalorder %s2408_s19, %s2408_s19 }
  0x2d   :  { %p2415_p8 = por %p2414_p7, %p2413_p6 }
  0x2f   :  { %p2416_p9 = pnand %p2415_p8, %p2409_p5 }
  0x31   :  { %2419 = shalt.err (!%p2416_p9)
}
  0x32   :  { %44 = dma.hbm_to_vmem [thread:$0]  %s3143_s2, 2048, %s39_s29, [#allocation6], %s2449_s22, %s2449_s22, %s2450_s23  }
  0x33   :  { %2442 = dma.done.wait [#allocation3], 128  }
  0x34   :  { %2443 = vsyncadd [#allocation3], 4294967168 }
  0x35   :  { %2444 = dma.done.wait [#allocation6], 4096  }
  0x36   :  { %2445 = vsyncadd [#allocation6], 4294963200  ;;  %v3157_v0 = vmov 0.0|0.0   ;;  %vm2454_vm0 = vmmov 0   ;;  %v3145_v1 = vmov 0.0   ;;  %v55_v2 = vlaneseq  ;;  %v97_v3 = vld [vmem:[#allocation7] sm:$0xff] }
  0x37   :  { %2036 = vmatprep.subr.bf16.mxu1 %v3157_v0  ;;  %2180 = vmatprep.subr.bf16.mxu0 %v3157_v0  ;;  %v98_v4 = vld [vmem:[#allocation7 + $0x8] sm:$0xff]  ;;  %v81_v5 = vld [vmem:[#allocation5] sm:$0xff]  ;;  %v114_v7 = vand.u32 4294901760, %v97_v3  ;;  %v99_v11 = vld [vmem:[#allocation7 + $0x10] sm:$0xff]  ;;  %s2456_s2 = smov [#allocation8]  }
  0x38   :  { %1648 = vmatprep.mubr.msk.f32.mxu1 %vm2454_vm0, %v3145_v1  ;;  %1858 = vmatprep.mubr.msk.f32.mxu0 %vm2454_vm0, %v3145_v1  ;;  %v56_v6 = vshrl.u32 %v55_v2, 7  ;;  %v117_v8 = vand.u32 4294901760, %v98_v4  ;;  %v82_v9 = vld [vmem:[#allocation5 + $0x8] sm:$0xff]  ;;  %v755_v10 = vand.u32 4294901760, %v81_v5  ;;  %v100_v12 = vld [vmem:[#allocation7 + $0x18] sm:$0xff]  ;;  %v120_v14 = vand.u32 4294901760, %v99_v11 }
  0x39   :  { %v758_v13 = vand.u32 4294901760, %v82_v9  ;;  %v123_v15 = vand.u32 4294901760, %v100_v12  ;;  %v83_v16 = vld [vmem:[#allocation5 + $0x10] sm:$0xff]  ;;  %v84_v17 = vld [vmem:[#allocation5 + $0x18] sm:$0xff]  ;;  %v101_v18 = vld [vmem:[#allocation7 + $0x20] sm:$0xff]  ;;  %v2529_v24 = vand.u32 127, %v55_v2  ;;  %v2536_v36 = vsub.f32 %v97_v3, %v114_v7 }
  0x3a   :  { %v2525_v19 = vpack.c.bf16 %v117_v8, %v114_v7  ;;  %v102_v20 = vld [vmem:[#allocation7 + $0x28] sm:$0xff]  ;;  %v85_v21 = vld [vmem:[#allocation5 + $0x20] sm:$0xff]  ;;  %v63_v25 = vand.u32 3, %v56_v6  ;;  %v761_v27 = vand.u32 4294901760, %v83_v16  ;;  %v764_v28 = vand.u32 4294901760, %v84_v17  ;;  %v103_v30 = vld [vmem:[#allocation7 + $0x30] sm:$0xff] }
  0x3b   :  { %v86_v22 = vld [vmem:[#allocation5 + $0x28] sm:$0xff]  ;;  %v2527_v23 = vpack.c.bf16 %v758_v13, %v755_v10  ;;  %v2532_v26 = vpack.c.bf16 %v123_v15, %v120_v14  ;;  %v126_v29 = vand.u32 4294901760, %v101_v18  ;;  %v129_v31 = vand.u32 4294901760, %v102_v20  ;;  %v104_v34 = vld [vmem:[#allocation7 + $0x38] sm:$0xff]  ;;  %v87_v35 = vld [vmem:[#allocation5 + $0x30] sm:$0xff]  ;;  %s1402_s21 = sshll.u32 %s2456_s2, 4  ;;  %s1403_s21 = int_to_ptr.vmem [resolvable:$true] %s1402_s21 }
  0x3c   :  { %3211 = vst [vmem:[#allocation12_spill] sm:$0xff] %v2525_v19  ;;  %2038 = vmatpush3.bf16.msra.mxu1 %v2525_v19  ;;  %v767_v32 = vand.u32 4294901760, %v85_v21  ;;  %v770_v33 = vand.u32 4294901760, %v86_v22  ;;  %v2538_v37 = vsub.f32 %v98_v4, %v117_v8  ;;  %v2540_v38 = vsub.f32 %v81_v5, %v755_v10  ;;  %v88_v40 = vld [vmem:[#allocation5 + $0x38] sm:$0xff]  ;;  %v105_v45 = vld [vmem:[#allocation7 + $0x40] sm:$0xff]  ;;  %v106_v46 = vld [vmem:[#allocation7 + $0x48] sm:$0xff]  ;;  %p2425_p11 = scmp.lt.s32.totalorder %s1403_s21, %s1403_s21 }
  0x3d   :  { %3212 = vst [vmem:[#allocation13_spill] sm:$0xff] %v2527_v23  ;;  %3213 = vst [vmem:[#allocation14_spill] sm:$0xff] %v2532_v26  ;;  %2182 = vmatpush3.bf16.msra.mxu0 %v2527_v23  ;;  %2039 = vmatprep.subr.bf16.mxu1 %v3157_v0  ;;  %v2543_v39 = vpack.c.bf16 %v764_v28, %v761_v27  ;;  %v2545_v41 = vsub.f32 %v82_v9, %v758_v13  ;;  %v132_v44 = vand.u32 4294901760, %v103_v30  ;;  %v89_v52 = vld [vmem:[#allocation5 + $0x40] sm:$0xff]  ;;  %v90_v53 = vld [vmem:[#allocation5 + $0x48] sm:$0xff]  ;;  %s2420_s22 = scalar_lea.vmem %s1403_s21, 128 }
  0x3e   :  { %2183 = vmatprep.subr.bf16.mxu0 %v3157_v0  ;;  %v2547_v42 = vsub.f32 %v99_v11, %v120_v14  ;;  %v2549_v43 = vsub.f32 %v100_v12, %v123_v15  ;;  %vm76_vm1 = vcmp.ge.s32.totalorder %v2529_v24, 96  ;;  %vm2552_vm2 = vcmp.ne.s32.totalorder %v63_v25, 0  ;;  %v107_v59 = vld [vmem:[#allocation7 + $0x50] sm:$0xff]  ;;  %v108_v2 = vld [vmem:[#allocation7 + $0x58] sm:$0xff]  ;;  %v109_v9 = vld [vmem:[#allocation7 + $0x60] sm:$0xff]  ;;  %p2421_p10 = scmp.ne.s32.totalorder %s1403_s21, %s2420_s22  ;;  %p2426_p12 = scmp.lt.s32.totalorder %s2420_s22, %s2420_s22 }
  0x3f   :  { %3214 = vst [vmem:[#allocation15_spill] sm:$0xff] %v2543_v39  ;;  %v2557_v48 = vsub.f32 %v83_v16, %v761_v27  ;;  %v2559_v49 = vpack.c.bf16 %v129_v31, %v126_v29  ;;  %v135_v50 = vand.u32 4294901760, %v104_v34  ;;  %v773_v51 = vand.u32 4294901760, %v87_v35  ;;  %v91_v3 = vld [vmem:[#allocation5 + $0x50] sm:$0xff]  ;;  %v92_v4 = vld [vmem:[#allocation5 + $0x58] sm:$0xff]  ;;  %v110_v10 = vld [vmem:[#allocation7 + $0x68] sm:$0xff] }
  0x40   :  { %2041 = vmatpush3.bf16.msra.mxu1 %v2532_v26  ;;  %vm73_vm3 = vcmp.lt.s32.totalorder %v2529_v24, 32  ;;  %vm2562_vm4 = vcmp.ne.s32.totalorder %v63_v25, 3  ;;  %v2567_v55 = vsub.f32 %v84_v17, %v764_v28  ;;  %v2570_v56 = vsub.f32 %v101_v18, %v126_v29  ;;  %vm78_vm5 = vmand %vm76_vm1, %vm2552_vm2  ;;  %p2427_p13 = por %p2426_p12, %p2425_p11 }
  0x41   :  { %3217 = vst [vmem:[#allocation16_spill] sm:$0xff] %v2559_v49  ;;  %2185 = vmatpush3.bf16.msra.mxu0 %v2543_v39  ;;  %2042 = vmatprep.subr.bf16.mxu1 %v3157_v0  ;;  %v2572_v57 = vpack.c.bf16 %v770_v33, %v767_v32  ;;  %v776_v58 = vand.u32 4294901760, %v88_v40  ;;  %v2575_v60 = vsub.f32 %v102_v20, %v129_v31  ;;  %v138_v62 = vand.u32 4294901760, %v105_v45  ;;  %v2594_v20 = vld [vmem:[#allocation5 + $0x60] sm:$0xff]  ;;  %vm75_vm6 = vmand %vm73_vm3, %vm2562_vm4 }
  0x42   :  { %2186 = vmatprep.subr.bf16.mxu0 %v3157_v0  ;;  %v2577_v61 = vsub.f32 %v85_v21, %v767_v32  ;;  %v141_v63 = vand.u32 4294901760, %v106_v46  ;;  %v2579_v5 = vsub.f32 %v86_v22, %v770_v33  ;;  %v2581_v6 = vsub.f32 %v103_v30, %v132_v44  ;;  %v2596_v21 = vld [vmem:[#allocation5 + $0x68] sm:$0xff]  ;;  %p2428_p0 = pnand %p2427_p13, %p2421_p10 }
  0x43   :  { %3220 = vst [vmem:[#allocation17_spill] sm:$0xff] %v2572_v57  ;;  %v779_v7 = vand.u32 4294901760, %v89_v52  ;;  %v782_v8 = vand.u32 4294901760, %v90_v53  ;;  %v2584_v11 = vpack.c.bf16 %v135_v50, %v132_v44  ;;  %v2586_v12 = vsub.f32 %v104_v34, %v135_v50  ;;  %v54_v44 = vld [vmem:[#allocation2] sm:$0xff] }
  0x44   :  { %2044 = vmatpush3.bf16.msra.mxu1 %v2559_v49  ;;  %v2588_v13 = vpack.c.bf16 %v776_v58, %v773_v51  ;;  %v2590_v14 = vsub.f32 %v87_v35, %v773_v51  ;;  %v144_v15 = vand.u32 4294901760, %v107_v59  ;;  %v147_v16 = vand.u32 4294901760, %v108_v2  ;;  %v2626_v51 = vld [vmem:[#allocation7 + $0x70] sm:$0xff] }
  0x45   :  { %3221 = vst [vmem:[#allocation18_spill] sm:$0xff] %v2584_v11  ;;  %2188 = vmatpush3.bf16.msra.mxu0 %v2572_v57  ;;  %2045 = vmatprep.subr.bf16.mxu1 %v3157_v0  ;;  %v785_v17 = vand.u32 4294901760, %v91_v3  ;;  %v788_v18 = vand.u32 4294901760, %v92_v4  ;;  %v2599_v22 = vsub.f32 %v88_v40, %v776_v58  ;;  %v2601_v25 = vpack.c.bf16 %v141_v63, %v138_v62 }
  0x46   :  { %3222 = vst [vmem:[#allocation19_spill] sm:$0xff] %v2588_v13  ;;  %2189 = vmatprep.subr.bf16.mxu0 %v3157_v0  ;;  %v150_v27 = vand.u32 4294901760, %v109_v9  ;;  %v153_v28 = vand.u32 4294901760, %v110_v10  ;;  %v2603_v29 = vsub.f32 %v105_v45, %v138_v62  ;;  %v2605_v30 = vsub.f32 %v106_v46, %v141_v63 }
  0x47   :  { %3223 = vst [vmem:[#allocation20_spill] sm:$0xff] %v2601_v25  ;;  %v2607_v31 = vpack.c.bf16 %v782_v8, %v779_v7  ;;  %v2609_v32 = vsub.f32 %v89_v52, %v779_v7  ;;  %v2612_v33 = vsub.f32 %v90_v53, %v782_v8  ;;  %v2614_v34 = vpack.c.bf16 %v147_v16, %v144_v15  ;;  %v2628_v52 = vld [vmem:[#allocation7 + $0x78] sm:$0xff]  ;;  %v2630_v53 = vld [vmem:[#allocation5 + $0x70] sm:$0xff] }
  0x48   :  { %2047 = vmatpush3.bf16.msra.mxu1 %v2584_v11  ;;  %v791_v35 = vand.u32 4294901760, %v2594_v20  ;;  %v3147_v40 = vand.u32 4294901760, %v2596_v21  ;;  %v2620_v45 = vsub.f32 %v107_v59, %v144_v15  ;;  %v2622_v46 = vsub.f32 %v108_v2, %v147_v16  ;;  %v2641_v2 = vld [vmem:[#allocation5 + $0x78] sm:$0xff] }
  0x49   :  { %3224 = vst [vmem:[#allocation21_spill] sm:$0xff] %v2607_v31  ;;  %3225 = vst [vmem:[#allocation22_spill] sm:$0xff] %v2614_v34  ;;  %2191 = vmatpush3.bf16.msra.mxu0 %v2588_v13  ;;  %2048 = vmatprep.subr.bf16.mxu1 %v3157_v0  ;;  %v2624_v50 = vpack.c.bf16 %v788_v18, %v785_v17  ;;  %v2633_v58 = vsub.f32 %v91_v3, %v785_v17  ;;  %v71_v8 = vrot.slane %v54_v44, 7 }
  0x4a   :  { %2192 = vmatprep.subr.bf16.mxu0 %v3157_v0  ;;  %v2635_v62 = vsub.f32 %v92_v4, %v788_v18  ;;  %v2637_v63 = vpack.c.bf16 %v153_v28, %v150_v27  ;;  %v2639_v59 = vsub.f32 %v109_v9, %v150_v27  ;;  %v2647_v7 = vsub.f32 %v110_v10, %v153_v28 }
  0x4b   :  { %3226 = vst [vmem:[#allocation23_spill] sm:$0xff] %v2624_v50  ;;  %v72_v15 = vrot.slane %v54_v44, 1  ;;  %v3148_v3 = vand.u32 4294901760, %v2536_v36  ;;  %v2657_v4 = vpack.c.bf16 %v3147_v40, %v791_v35  ;;  %v3161_v47 = vand.u32 4294901760, %v2626_v51 }
  0x4c   :  { %3227 = vst [vmem:[#allocation24_spill] sm:$0xff] %v2637_v63  ;;  %2050 = vmatpush3.bf16.msra.mxu1 %v2601_v25  ;;  %v79_v54 = vsel %vm78_vm5, %v71_v8, 0.0  ;;  %v3149_v17 = vand.u32 4294901760, %v2538_v37  ;;  %v2670_v27 = vand.u32 4294901760, %v54_v44  ;;  %v3150_v28 = vand.u32 4294901760, %v2540_v38 }
  0x4d   :  { %3228 = vst [vmem:[#allocation25_spill] sm:$0xff] %v2657_v4  ;;  %2194 = vmatpush3.bf16.msra.mxu0 %v2607_v31  ;;  %2051 = vmatprep.subr.bf16.mxu1 %v3157_v0  ;;  %v208_v16 = vsub.f32 %v2536_v36, %v3148_v3  ;;  %v80_v18 = vsel %vm75_vm6, %v72_v15, %v79_v54  ;;  %v3151_v1 = vand.u32 4294901760, %v2545_v41  ;;  %v3156_v3 = vand.u32 4294901760, %v2547_v42 }
  0x4e   :  { %2195 = vmatprep.subr.bf16.mxu0 %v3157_v0  ;;  %v2674_v40 = vand.u32 4294901760, %v80_v18  ;;  %v215_v8 = vsub.f32 %v2538_v37, %v3149_v17  ;;  %v2682_v24 = vsub.f32 %v54_v44, %v2670_v27  ;;  %v849_v15 = vsub.f32 %v2540_v38, %v3150_v28 }
  0x4f   :  { %v209_v10 = vand.u32 4294901760, %v208_v16  ;;  %v856_v54 = vsub.f32 %v2545_v41, %v3151_v1  ;;  %v222_v44 = vsub.f32 %v2547_v42, %v3156_v3  ;;  %v2702_v1 = vsub.f32 %v2594_v20, %v791_v35 }
  0x50   :  { %2053 = vmatpush3.bf16.msra.mxu1 %v2614_v34  ;;  %3229 = vst [vmem:[#allocation26_spill] sm:$0xff] %v2682_v24  ;;  %v2694_v17 = vsub.f32 %v80_v18, %v2674_v40  ;;  %v216_v9 = vand.u32 4294901760, %v215_v8  ;;  %v3231_v16 = vand.u32 4294901760, %v2628_v52  ;;  %v3166_v18 = vand.u32 4294901760, %v2682_v24 }
  0x51   :  { %2197 = vmatpush3.bf16.msra.mxu0 %v2624_v50  ;;  %2054 = vmatprep.subr.bf16.mxu1 %v3157_v0  ;;  %v3233_v8 = vand.u32 4294901760, %v2549_v43  ;;  %v3234_v3 = vand.u32 4294901760, %v2630_v53  ;;  %v3235_v28 = vand.u32 4294901760, %v2641_v2  ;;  %v850_v35 = vand.u32 4294901760, %v849_v15 }
  0x52   :  { %3230 = vst [vmem:[#allocation27_spill] sm:$0xff] %v2694_v17  ;;  %2198 = vmatprep.subr.bf16.mxu0 %v3157_v0  ;;  %v2708_v50 = vpack.c.bf16 %v3231_v16, %v3161_v47  ;;  %v3173_v20 = vand.u32 4294901760, %v2694_v17  ;;  %v3237_v31 = vand.u32 4294901760, %v2557_v48  ;;  %v2061_v47 = vpack.c.bf16 %v216_v9, %v209_v10 }
  0x53   :  { %v229_v34 = vsub.f32 %v2549_v43, %v3233_v8  ;;  %v2718_v0 = vpack.c.bf16 %v3235_v28, %v3234_v3  ;;  %v838_v8 = vsub.f32 %v2682_v24, %v3166_v18  ;;  %v857_v25 = vand.u32 4294901760, %v856_v54 }
  0x54   :  { %3232 = vst [vmem:[#allocation28_spill] sm:$0xff] %v2708_v50  ;;  %v863_v16 = vsub.f32 %v2557_v48, %v3237_v31  ;;  %2056 = vmatpush3.bf16.msra.mxu1 %v2637_v63  ;;  %v3176_v13 = vand.u32 4294901760, %v2567_v55  ;;  %v3238_v3 = vmov 0.0|0.0   ;;  %v197_v28 = vsub.f32 %v2694_v17, %v3173_v20 }
  0x55   :  { %3236 = vst [vmem:[#allocation29_spill] sm:$0xff] %v2718_v0  ;;  %2200 = vmatpush3.bf16.msra.mxu0 %v2657_v4  ;;  %2057 = vmatprep.subr.bf16.mxu1 %v3238_v3  ;;  %v223_v15 = vand.u32 4294901760, %v222_v44  ;;  %v3177_v31 = vand.u32 4294901760, %v2570_v56  ;;  %v230_v10 = vand.u32 4294901760, %v229_v34  ;;  %v3181_v4 = vand.u32 4294901760, %v2577_v61 }
  0x56   :  { %2201 = vmatprep.subr.bf16.mxu0 %v3238_v3  ;;  %v864_v18 = vand.u32 4294901760, %v863_v16  ;;  %v870_v54 = vsub.f32 %v2567_v55, %v3176_v13  ;;  %v198_v63 = vand.u32 4294901760, %v197_v28  ;;  %v839_v11 = vand.u32 4294901760, %v838_v8 }
  0x57   :  { %v236_v44 = vsub.f32 %v2570_v56, %v3177_v31  ;;  %v3180_v20 = vand.u32 4294901760, %v2579_v5  ;;  %v3239_v34 = vand.u32 4294901760, %v2575_v60  ;;  %v2205_v8 = vpack.c.bf16 %v857_v25, %v850_v35 }
  0x58   :  { %2059 = vmatpush3.bf16.msra.mxu1 %v2708_v50  ;;  %v871_v9 = vand.u32 4294901760, %v870_v54  ;;  %v877_v28 = vsub.f32 %v2577_v61, %v3181_v4  ;;  %v3242_v13 = vand.u32 4294901760, %v2626_v51  ;;  %v3243_v25 = vand.u32 4294901760, %v2581_v6 }
  0x59   :  { %v243_v16 = vsub.f32 %v2575_v60, %v3239_v34  ;;  %2203 = vmatpush3.bf16.msra.mxu0 %v2718_v0  ;;  %2060 = vmatprep.subr.bf16.mxu1 %v3238_v3  ;;  %v884_v54 = vsub.f32 %v2579_v5, %v3180_v20  ;;  %v3240_v34 = vand.u32 4294901760, %v2596_v21  ;;  %v3244_v20 = vand.u32 4294901760, %v2586_v12 }
  0x5a   :  { %v2768_v0 = vsub.f32 %v2626_v51, %v3242_v13  ;;  %2204 = vmatprep.subr.bf16.mxu0 %v3238_v3  ;;  %v250_v35 = vsub.f32 %v2581_v6, %v3243_v25  ;;  %v2064_v31 = vpack.c.bf16 %v230_v10, %v223_v15  ;;  %v237_v50 = vand.u32 4294901760, %v236_v44 }
  0x5b   :  { %v2763_v57 = vsub.f32 %v2596_v21, %v3240_v34  ;;  %v257_v4 = vsub.f32 %v2586_v12, %v3244_v20  ;;  %1649 = vmatmul.mubr.f32.vlgmr.msra.gmra.mrb[0].mxu1 %v198_v63  ;;  %v3245_v21 = vand.u32 4294901760, %v2590_v14  ;;  %v3191_v13 = vand.u32 4294901760, %v2599_v22 }
  0x5c   :  { %2062 = vmatpush3.bf16.msra.mxu1 %v2061_v47  ;;  %1859 = vmatmul.mubr.f32.vlgmr.msra.gmra.mrb[0].mxu0 %v839_v11  ;;  %v2208_v51 = vpack.c.bf16 %v871_v9, %v864_v18  ;;  %v244_v49 = vand.u32 4294901760, %v243_v16  ;;  %v3188_v39 = vand.u32 4294901760, %v2603_v29  ;;  %v3190_v25 = vand.u32 4294901760, %v2605_v30 }
  0x5d   :  { %3241 = vst [vmem:[#allocation30_spill] sm:$0xff] %v2763_v57  ;;  %v891_v34 = vsub.f32 %v2590_v14, %v3245_v21  ;;  %2206 = vmatpush3.bf16.msra.mxu0 %v2205_v8  ;;  %2063 = vmatprep.subr.bf16.mxu1 %v3238_v3  ;;  %v878_v63 = vand.u32 4294901760, %v877_v28  ;;  %v885_v20 = vand.u32 4294901760, %v884_v54  ;;  %v898_v15 = vsub.f32 %v2599_v22, %v3191_v13 }
  0x5e   :  { %v3189_v10 = vand.u32 4294901760, %v2609_v32  ;;  %2207 = vmatprep.subr.bf16.mxu0 %v3238_v3  ;;  %v251_v11 = vand.u32 4294901760, %v250_v35  ;;  %v258_v47 = vand.u32 4294901760, %v257_v4  ;;  %v264_v18 = vsub.f32 %v2603_v29, %v3188_v39 }
  0x5f   :  { %v3192_v9 = vand.u32 4294901760, %v2612_v33  ;;  %v3246_v44 = vmov 0.0   ;;  %v3247_v16 = vand.u32 4294901760, %v2628_v52  ;;  %v892_v28 = vand.u32 4294901760, %v891_v34 }
  0x60   :  { %1683 = vmatprep.mubr.msk.f32.mxu1 %vm2454_vm0, %v3246_v44  ;;  %v899_v54 = vand.u32 4294901760, %v898_v15  ;;  %v271_v4 = vsub.f32 %v2605_v30, %v3190_v25  ;;  %1893 = vmatprep.mubr.msk.f32.mxu0 %vm2454_vm0, %v3246_v44  ;;  %v2067_v35 = vpack.c.bf16 %v244_v49, %v237_v50  ;;  %v905_v21 = vsub.f32 %v2609_v32, %v3189_v10 }
  0x61   :  { %v2798_v8 = vsub.f32 %v2628_v52, %v3247_v16  ;;  %2065 = vmatpush3.bf16.msra.mxu1 %v2064_v31  ;;  %v3195_v39 = vand.u32 4294901760, %v2620_v45  ;;  %v3194_v52 = vand.u32 4294901760, %v2622_v46  ;;  %v3248_v34 = vand.u32 4294901760, %v2630_v53  ;;  %2209 = vmatpush3.bf16.msra.mxu0 %v2208_v51 }
  0x62   :  { %2066 = vmatprep.subr.bf16.mxu1 %v3238_v3  ;;  %v2211_v16 = vpack.c.bf16 %v885_v20, %v878_v63  ;;  %v912_v49 = vsub.f32 %v2612_v33, %v3192_v9  ;;  %v3249_v31 = vand.u32 4294901760, %v2641_v2  ;;  %2210 = vmatprep.subr.bf16.mxu0 %v3238_v3  ;;  %v2070_v25 = vpack.c.bf16 %v258_v47, %v251_v11 }
  0x63   :  { %v2813_v15 = vsub.f32 %v2630_v53, %v3248_v34  ;;  %v265_v53 = vand.u32 4294901760, %v264_v18  ;;  %v3193_v51 = vand.u32 4294901760, %v2635_v62  ;;  %v2214_v34 = vpack.c.bf16 %v899_v54, %v892_v28 }
  0x64   :  { %v2823_v10 = vsub.f32 %v2641_v2, %v3249_v31  ;;  %v272_v13 = vand.u32 4294901760, %v271_v4  ;;  %v3196_v63 = vand.u32 4294901760, %v2639_v59  ;;  %v3197_v20 = vand.u32 4294901760, %v2647_v7 }
  0x65   :  { %2068 = vmatpush3.bf16.msra.mxu1 %v2067_v35  ;;  %v906_v9 = vand.u32 4294901760, %v905_v21  ;;  %v278_v50 = vsub.f32 %v2620_v45, %v3195_v39  ;;  %v285_v2 = vsub.f32 %v2622_v46, %v3194_v52  ;;  %v3202_v11 = vand.u32 4294901760, %v2702_v1  ;;  %2212 = vmatpush3.bf16.msra.mxu0 %v2211_v16 }
  0x66   :  { %2069 = vmatprep.subr.bf16.mxu1 %v3238_v3  ;;  %v913_v47 = vand.u32 4294901760, %v912_v49  ;;  %v3250_v18 = vand.u32 4294901760, %v2633_v58  ;;  %v926_v54 = vsub.f32 %v2635_v62, %v3193_v51  ;;  %v939_v4 = vand.u32 4294901760, %v2763_v57  ;;  %2213 = vmatprep.subr.bf16.mxu0 %v3238_v3 }
  0x67   :  { %v292_v35 = vsub.f32 %v2639_v59, %v3196_v63  ;;  %v299_v21 = vsub.f32 %v2647_v7, %v3197_v20  ;;  %v933_v16 = vsub.f32 %v2702_v1, %v3202_v11  ;;  %v305_v31 = vand.u32 4294901760, %v2768_v0 }
  0x68   :  { %v919_v28 = vsub.f32 %v2633_v58, %v3250_v18  ;;  %v940_v49 = vsub.f32 %v2763_v57, %v939_v4  ;;  %v312_v18 = vand.u32 4294901760, %v2798_v8  ;;  %v946_v51 = vand.u32 4294901760, %v2813_v15 }
  0x69   :  { %2071 = vmatpush3.bf16.msra.mxu1 %v2070_v25  ;;  %v2073_v52 = vpack.c.bf16 %v272_v13, %v265_v53  ;;  %v279_v39 = vand.u32 4294901760, %v278_v50  ;;  %v286_v63 = vand.u32 4294901760, %v285_v2  ;;  %2215 = vmatpush3.bf16.msra.mxu0 %v2214_v34  ;;  %v2217_v20 = vpack.c.bf16 %v913_v47, %v906_v9 }
  0x6a   :  { %2072 = vmatprep.subr.bf16.mxu1 %v3238_v3  ;;  %v920_v26 = vand.u32 4294901760, %v919_v28  ;;  %v927_v23 = vand.u32 4294901760, %v926_v54  ;;  %v953_v11 = vand.u32 4294901760, %v2823_v10  ;;  %2216 = vmatprep.subr.bf16.mxu0 %v3238_v3  ;;  %v293_v24 = vand.u32 4294901760, %v292_v35 }
  0x6b   :  { %v300_v19 = vand.u32 4294901760, %v299_v21  ;;  %v934_v17 = vand.u32 4294901760, %v933_v16  ;;  %v941_v57 = vand.u32 4294901760, %v940_v49  ;;  %v306_v44 = vsub.f32 %v2768_v0, %v305_v31 }
  0x6c   :  { %v313_v13 = vsub.f32 %v2798_v8, %v312_v18  ;;  %v947_v25 = vsub.f32 %v2813_v15, %v946_v51  ;;  %v2076_v50 = vpack.c.bf16 %v286_v63, %v279_v39  ;;  %v2220_v9 = vpack.c.bf16 %v927_v23, %v920_v26 }
  0x6d   :  { %2074 = vmatpush3.bf16.msra.mxu1 %v2073_v52  ;;  %2218 = vmatpush3.bf16.msra.mxu0 %v2217_v20  ;;  %v954_v53 = vsub.f32 %v2823_v10, %v953_v11  ;;  %v2079_v34 = vpack.c.bf16 %v300_v19, %v293_v24  ;;  %v2223_v2 = vpack.c.bf16 %v941_v57, %v934_v17  ;;  %v307_v47 = vand.u32 4294901760, %v306_v44 }
  0x6e   :  { %2075 = vmatprep.subr.bf16.mxu1 %v3238_v3  ;;  %2219 = vmatprep.subr.bf16.mxu0 %v3238_v3  ;;  %v314_v28 = vand.u32 4294901760, %v313_v13  ;;  %v948_v54 = vand.u32 4294901760, %v947_v25  ;;  %v3251_v35 = vand.u32 4294901760, %v2536_v36  ;;  %v3252_v21 = vand.u32 4294901760, %v2538_v37 }
  0x6f   :  { %v3253_v39 = vand.u32 4294901760, %v2540_v38  ;;  %v3254_v23 = vand.u32 4294901760, %v2545_v41  ;;  %v3255_v63 = vand.u32 4294901760, %v2547_v42  ;;  %v3256_v19 = vand.u32 4294901760, %v2549_v43 }
  0x70   :  { %v2871_v52 = vpack.c.bf16 %v3252_v21, %v3251_v35  ;;  %v3257_v24 = vand.u32 4294901760, %v2557_v48  ;;  %v3258_v17 = vand.u32 4294901760, %v2567_v55  ;;  %v955_v20 = vand.u32 4294901760, %v954_v53 }
  0x71   :  { %2077 = vmatpush3.bf16.msra.mxu1 %v2076_v50  ;;  %v2877_v26 = vpack.c.bf16 %v3254_v23, %v3253_v39  ;;  %v2883_v57 = vpack.c.bf16 %v3256_v19, %v3255_v63  ;;  %2221 = vmatpush3.bf16.msra.mxu0 %v2220_v9  ;;  %v3259_v16 = vand.u32 4294901760, %v2570_v56  ;;  %v3260_v49 = vand.u32 4294901760, %v2575_v60 }
  0x72   :  { %v2889_v44 = vpack.c.bf16 %v3258_v17, %v3257_v24  ;;  %2078 = vmatprep.subr.bf16.mxu1 %v3238_v3  ;;  %v3261_v25 = vand.u32 4294901760, %v2577_v61  ;;  %v3262_v50 = vand.u32 4294901760, %v2579_v5  ;;  %v3263_v21 = vand.u32 4294901760, %v2581_v6  ;;  %2222 = vmatprep.subr.bf16.mxu0 %v3238_v3 }
  0x73   :  { %v2896_v13 = vpack.c.bf16 %v3260_v49, %v3259_v16  ;;  %v3264_v39 = vand.u32 4294901760, %v2586_v12  ;;  %v3265_v53 = vand.u32 4294901760, %v2590_v14  ;;  %v3266_v23 = vand.u32 4294901760, %v2599_v22 }
  0x74   :  { %v2902_v35 = vpack.c.bf16 %v3262_v50, %v3261_v25  ;;  %v3268_v19 = vand.u32 4294901760, %v2603_v29  ;;  %v3269_v24 = vand.u32 4294901760, %v2605_v30  ;;  %v3271_v16 = vand.u32 4294901760, %v2609_v32 }
  0x75   :  { %v2908_v9 = vpack.c.bf16 %v3264_v39, %v3263_v21  ;;  %v2915_v63 = vpack.c.bf16 %v3266_v23, %v3265_v53  ;;  %v3272_v49 = vand.u32 4294901760, %v2612_v33  ;;  %v3274_v50 = vand.u32 4294901760, %v2620_v45  ;;  %2080 = vmatpush3.bf16.msra.mxu1 %v2079_v34  ;;  %2224 = vmatpush3.bf16.msra.mxu0 %v2223_v2 }
  0x76   :  { %v2921_v17 = vpack.c.bf16 %v3269_v24, %v3268_v19  ;;  %v3275_v21 = vand.u32 4294901760, %v2622_v46  ;;  %v3276_v53 = vand.u32 4294901760, %v2633_v58  ;;  %v3277_v23 = vand.u32 4294901760, %v2635_v62  ;;  %2081 = vmatprep.subr.bf16.mxu1 %v3238_v3  ;;  %2225 = vmatprep.subr.bf16.mxu0 %v3238_v3 }
  0x77   :  { %3267 = vst [vmem:[#allocation31_spill] sm:$0xff] %v2915_v63  ;;  %v2927_v25 = vpack.c.bf16 %v3272_v49, %v3271_v16  ;;  %v3278_v19 = vand.u32 4294901760, %v2639_v59  ;;  %v3279_v24 = vand.u32 4294901760, %v2647_v7  ;;  %v3280_v16 = vand.u32 4294901760, %v2702_v1 }
  0x78   :  { %3270 = vst [vmem:[#allocation32_spill] sm:$0xff] %v2921_v17  ;;  %v2933_v39 = vpack.c.bf16 %v3275_v21, %v3274_v50  ;;  %v2939_v63 = vpack.c.bf16 %v3277_v23, %v3276_v53  ;;  %v2082_v50 = vpack.c.bf16 %v314_v28, %v307_v47  ;;  %v2953_v21 = vpack.c.bf16 %v953_v11, %v946_v51  ;;  %v3299_v11 = vld [vmem:[#allocation28_spill] sm:$0xff] }
  0x79   :  { %3273 = vst [vmem:[#allocation33_spill] sm:$0xff] %v2927_v25  ;;  %v2945_v17 = vpack.c.bf16 %v3279_v24, %v3278_v19  ;;  %v2949_v49 = vpack.c.bf16 %v939_v4, %v3280_v16  ;;  %v2951_v25 = vpack.c.bf16 %v312_v18, %v305_v31  ;;  %v2226_v53 = vpack.c.bf16 %v955_v20, %v948_v54  ;;  %v3300_v31 = vld [vmem:[#allocation29_spill] sm:$0xff] }
  0x7a   :  { %2083 = vmatpush3.bf16.msra.mxu1 %v2082_v50  ;;  %v2085_v23 = vpack.c.bf16 %v2538_v37, %v2536_v36  ;;  %v2229_v4 = vpack.c.bf16 %v2545_v41, %v2540_v38  ;;  %v2088_v51 = vpack.c.bf16 %v2549_v43, %v2547_v42  ;;  %v2232_v36 = vpack.c.bf16 %v2567_v55, %v2557_v48 }
  0x7b   :  { %2227 = vmatpush3.bf16.msra.mxu0 %v2226_v53  ;;  %2084 = vmatprep.subr.bf16.mxu1 %v3238_v3  ;;  %v3281_v37 = vmov 0.0   ;;  %v2091_v38 = vpack.c.bf16 %v2575_v60, %v2570_v56  ;;  %v2235_v41 = vpack.c.bf16 %v2579_v5, %v2577_v61  ;;  %v2094_v42 = vpack.c.bf16 %v2586_v12, %v2581_v6  ;;  %v3282_v5 = vld [vmem:[#allocation30_spill] sm:$0xff] }
  0x7c   :  { %2228 = vmatprep.subr.bf16.mxu0 %v3238_v3  ;;  %v2238_v43 = vpack.c.bf16 %v2599_v22, %v2590_v14  ;;  %v2097_v48 = vpack.c.bf16 %v2605_v30, %v2603_v29  ;;  %v2241_v55 = vpack.c.bf16 %v2612_v33, %v2609_v32  ;;  %v2100_v56 = vpack.c.bf16 %v2622_v46, %v2620_v45  ;;  %v3284_v22 = vld [vmem:[#allocation12_spill] sm:$0xff]  ;;  %v3285_v29 = vld [vmem:[#allocation26_spill] sm:$0xff]  ;;  %v3288_v32 = vld [vmem:[#allocation15_spill] sm:$0xff] }
  0x7d   :  { %1684 = vmatmul.mubr.f32.vlgmr.msra.gmra.mrb[0].mxu1 %v2674_v40  ;;  %v2244_v60 = vpack.c.bf16 %v2635_v62, %v2633_v58  ;;  %v2103_v61 = vpack.c.bf16 %v2647_v7, %v2639_v59  ;;  %v2247_v6 = vpack.c.bf16 %v3282_v5, %v2702_v1  ;;  %v2106_v12 = vpack.c.bf16 %v2798_v8, %v2768_v0  ;;  %v3283_v1 = vld [vmem:[#allocation27_spill] sm:$0xff]  ;;  %v3286_v0 = vld [vmem:[#allocation13_spill] sm:$0xff]  ;;  %v3287_v30 = vld [vmem:[#allocation14_spill] sm:$0xff] }
  0x7e   :  { %2086 = vmatpush3.bf16.msra.mxu1 %v2085_v23  ;;  %1894 = vmatmul.mubr.f32.vlgmr.msra.gmra.mrb[0].mxu0 %v2670_v27  ;;  %v2250_v14 = vpack.c.bf16 %v2823_v10, %v2813_v15  ;;  %v3289_v33 = vld [vmem:[#allocation16_spill] sm:$0xff]  ;;  %v3290_v45 = vld [vmem:[#allocation17_spill] sm:$0xff]  ;;  %v3291_v46 = vld [vmem:[#allocation18_spill] sm:$0xff]  ;;  %v3301_v18 = vand.u32 4294901760, %v3283_v1  ;;  %v3302_v34 = vand.u32 4294901760, %v3285_v29 }
  0x7f   :  { %2230 = vmatpush3.bf16.msra.mxu0 %v2229_v4  ;;  %2087 = vmatprep.subr.bf16.mxu1 %v3238_v3  ;;  %v3292_v58 = vld [vmem:[#allocation19_spill] sm:$0xff]  ;;  %v3293_v62 = vld [vmem:[#allocation20_spill] sm:$0xff]  ;;  %v3294_v59 = vld [vmem:[#allocation21_spill] sm:$0xff] }
  0x80   :  { %2231 = vmatprep.subr.bf16.mxu0 %v3238_v3  ;;  %1718 = vmatprep.mubr.msk.f32.mxu1 %vm2454_vm0, %v3281_v37  ;;  %v3295_v7 = vld [vmem:[#allocation22_spill] sm:$0xff]  ;;  %v3296_v10 = vld [vmem:[#allocation23_spill] sm:$0xff]  ;;  %v3297_v8 = vld [vmem:[#allocation24_spill] sm:$0xff] }
  0x81   :  { %1928 = vmatprep.mubr.msk.f32.mxu0 %vm2454_vm0, %v3281_v37  ;;  %v3298_v15 = vld [vmem:[#allocation25_spill] sm:$0xff]  ;;  %v3303_v2 = vld [vmem:[#allocation31_spill] sm:$0xff]  ;;  %v3304_v47 = vld [vmem:[#allocation32_spill] sm:$0xff] }
  0x82   :  { %2089 = vmatpush3.bf16.msra.mxu1 %v2088_v51  ;;  %v3305_v28 = vld [vmem:[#allocation33_spill] sm:$0xff] }
  0x83   :  { %2233 = vmatpush3.bf16.msra.mxu0 %v2232_v36  ;;  %2090 = vmatprep.subr.bf16.mxu1 %v3238_v3 }
  0x84   :  { %2234 = vmatprep.subr.bf16.mxu0 %v3238_v3 }
  0x86   :  { %2092 = vmatpush3.bf16.msra.mxu1 %v2091_v38 }
  0x87   :  { %2236 = vmatpush3.bf16.msra.mxu0 %v2235_v41  ;;  %2093 = vmatprep.subr.bf16.mxu1 %v3238_v3 }
  0x88   :  { %2237 = vmatprep.subr.bf16.mxu0 %v3238_v3 }
  0x8a   :  { %2095 = vmatpush3.bf16.msra.mxu1 %v2094_v42 }
  0x8b   :  { %2239 = vmatpush3.bf16.msra.mxu0 %v2238_v43  ;;  %2096 = vmatprep.subr.bf16.mxu1 %v3238_v3 }
  0x8c   :  { %2240 = vmatprep.subr.bf16.mxu0 %v3238_v3 }
  0x8e   :  { %2098 = vmatpush3.bf16.msra.mxu1 %v2097_v48 }
  0x8f   :  { %2242 = vmatpush3.bf16.msra.mxu0 %v2241_v55  ;;  %2099 = vmatprep.subr.bf16.mxu1 %v3238_v3 }
  0x90   :  { %2243 = vmatprep.subr.bf16.mxu0 %v3238_v3 }
  0x92   :  { %2101 = vmatpush3.bf16.msra.mxu1 %v2100_v56 }
  0x93   :  { %2245 = vmatpush3.bf16.msra.mxu0 %v2244_v60  ;;  %2102 = vmatprep.subr.bf16.mxu1 %v3238_v3 }
  0x94   :  { %2246 = vmatprep.subr.bf16.mxu0 %v3238_v3 }
  0x96   :  { %2104 = vmatpush3.bf16.msra.mxu1 %v2103_v61 }
  0x97   :  { %2248 = vmatpush3.bf16.msra.mxu0 %v2247_v6  ;;  %2105 = vmatprep.subr.bf16.mxu1 %v3238_v3 }
  0x98   :  { %2249 = vmatprep.subr.bf16.mxu0 %v3238_v3 }
  0x9a   :  { %2107 = vmatpush3.bf16.msra.mxu1 %v2106_v12 }
  0x9b   :  { %2251 = vmatpush3.bf16.msra.mxu0 %v2250_v14  ;;  %2108 = vmatprep.subr.bf16.mxu1 %v3238_v3 }
  0x9c   :  { %2252 = vmatprep.subr.bf16.mxu0 %v3238_v3 }
  0x9d   :  { %1719 = vmatmul.mubr.f32.vlgmr.msra.gmra.mrb[0].mxu1 %v3283_v1 }
  0x9e   :  { %2110 = vmatpush3.bf16.msra.mxu1 %v3284_v22  ;;  %1929 = vmatmul.mubr.f32.vlgmr.msra.gmra.mrb[0].mxu0 %v3285_v29 }
  0x9f   :  { %2254 = vmatpush3.bf16.msra.mxu0 %v3286_v0  ;;  %2111 = vmatprep.subr.bf16.mxu1 %v3238_v3 }
  0xa0   :  { %2255 = vmatprep.subr.bf16.mxu0 %v3238_v3  ;;  %1753 = vmatprep.mubr.msk.f32.mxu1 %vm2454_vm0, %v3281_v37 }
  0xa1   :  { %1963 = vmatprep.mubr.msk.f32.mxu0 %vm2454_vm0, %v3281_v37 }
  0xa2   :  { %2113 = vmatpush3.bf16.msra.mxu1 %v3287_v30 }
  0xa3   :  { %2257 = vmatpush3.bf16.msra.mxu0 %v3288_v32  ;;  %2114 = vmatprep.subr.bf16.mxu1 %v3238_v3 }
  0xa4   :  { %2258 = vmatprep.subr.bf16.mxu0 %v3238_v3 }
  0xa6   :  { %2116 = vmatpush3.bf16.msra.mxu1 %v3289_v33 }
  0xa7   :  { %2260 = vmatpush3.bf16.msra.mxu0 %v3290_v45  ;;  %2117 = vmatprep.subr.bf16.mxu1 %v3238_v3 }
  0xa8   :  { %2261 = vmatprep.subr.bf16.mxu0 %v3238_v3 }
  0xaa   :  { %2119 = vmatpush3.bf16.msra.mxu1 %v3291_v46 }
  0xab   :  { %2263 = vmatpush3.bf16.msra.mxu0 %v3292_v58  ;;  %2120 = vmatprep.subr.bf16.mxu1 %v3238_v3 }
  0xac   :  { %2264 = vmatprep.subr.bf16.mxu0 %v3238_v3 }
  0xae   :  { %2122 = vmatpush3.bf16.msra.mxu1 %v3293_v62 }
  0xaf   :  { %2266 = vmatpush3.bf16.msra.mxu0 %v3294_v59  ;;  %2123 = vmatprep.subr.bf16.mxu1 %v3238_v3 }
  0xb0   :  { %2267 = vmatprep.subr.bf16.mxu0 %v3238_v3 }
  0xb2   :  { %2125 = vmatpush3.bf16.msra.mxu1 %v3295_v7 }
  0xb3   :  { %2269 = vmatpush3.bf16.msra.mxu0 %v3296_v10  ;;  %2126 = vmatprep.subr.bf16.mxu1 %v3238_v3 }
  0xb4   :  { %2270 = vmatprep.subr.bf16.mxu0 %v3238_v3 }
  0xb6   :  { %2128 = vmatpush3.bf16.msra.mxu1 %v3297_v8 }
  0xb7   :  { %2272 = vmatpush3.bf16.msra.mxu0 %v3298_v15  ;;  %2129 = vmatprep.subr.bf16.mxu1 %v3238_v3 }
  0xb8   :  { %2273 = vmatprep.subr.bf16.mxu0 %v3238_v3 }
  0xba   :  { %2131 = vmatpush3.bf16.msra.mxu1 %v3299_v11 }
  0xbb   :  { %2275 = vmatpush3.bf16.msra.mxu0 %v3300_v31  ;;  %2132 = vmatprep.subr.bf16.mxu1 %v3238_v3 }
  0xbc   :  { %2276 = vmatprep.subr.bf16.mxu0 %v3238_v3 }
  0xbd   :  { %1754 = vmatmul.mubr.f32.vlgmr.msra.gmra.mrb[0].mxu1 %v3301_v18 }
  0xbe   :  { %2134 = vmatpush3.bf16.msra.mxu1 %v2871_v52  ;;  %1964 = vmatmul.mubr.f32.vlgmr.msra.gmra.mrb[0].mxu0 %v3302_v34 }
  0xbf   :  { %2278 = vmatpush3.bf16.msra.mxu0 %v2877_v26  ;;  %2135 = vmatprep.subr.bf16.mxu1 %v3238_v3 }
  0xc0   :  { %2279 = vmatprep.subr.bf16.mxu0 %v3238_v3  ;;  %1788 = vmatprep.mubr.msk.f32.mxu1 %vm2454_vm0, %v3281_v37 }
  0xc1   :  { %1998 = vmatprep.mubr.msk.f32.mxu0 %vm2454_vm0, %v3281_v37 }
  0xc2   :  { %2137 = vmatpush3.bf16.msra.mxu1 %v2883_v57 }
  0xc3   :  { %2281 = vmatpush3.bf16.msra.mxu0 %v2889_v44  ;;  %2138 = vmatprep.subr.bf16.mxu1 %v3238_v3 }
  0xc4   :  { %2282 = vmatprep.subr.bf16.mxu0 %v3238_v3 }
  0xc6   :  { %2140 = vmatpush3.bf16.msra.mxu1 %v2896_v13 }
  0xc7   :  { %2284 = vmatpush3.bf16.msra.mxu0 %v2902_v35  ;;  %2141 = vmatprep.subr.bf16.mxu1 %v3238_v3 }
  0xc8   :  { %2285 = vmatprep.subr.bf16.mxu0 %v3238_v3 }
  0xca   :  { %2143 = vmatpush3.bf16.msra.mxu1 %v2908_v9 }
  0xcb   :  { %2287 = vmatpush3.bf16.msra.mxu0 %v3303_v2  ;;  %2144 = vmatprep.subr.bf16.mxu1 %v3238_v3 }
  0xcc   :  { %2288 = vmatprep.subr.bf16.mxu0 %v3238_v3 }
  0xce   :  { %2146 = vmatpush3.bf16.msra.mxu1 %v3304_v47 }
  0xcf   :  { %2290 = vmatpush3.bf16.msra.mxu0 %v3305_v28  ;;  %2147 = vmatprep.subr.bf16.mxu1 %v3238_v3 }
  0xd0   :  { %2291 = vmatprep.subr.bf16.mxu0 %v3238_v3 }
  0xd2   :  { %2149 = vmatpush3.bf16.msra.mxu1 %v2933_v39 }
  0xd3   :  { %2293 = vmatpush3.bf16.msra.mxu0 %v2939_v63  ;;  %2150 = vmatprep.subr.bf16.mxu1 %v3238_v3 }
  0xd4   :  { %2294 = vmatprep.subr.bf16.mxu0 %v3238_v3 }
  0xd6   :  { %2152 = vmatpush3.bf16.msra.mxu1 %v2945_v17 }
  0xd7   :  { %2296 = vmatpush3.bf16.msra.mxu0 %v2949_v49  ;;  %2153 = vmatprep.subr.bf16.mxu1 %v3238_v3 }
  0xd8   :  { %2297 = vmatprep.subr.bf16.mxu0 %v3238_v3 }
  0xda   :  { %2155 = vmatpush3.bf16.msra.mxu1 %v2951_v25 }
  0xdb   :  { %2299 = vmatpush3.bf16.msra.mxu0 %v2953_v21  ;;  %2156 = vmatprep.subr.bf16.mxu1 %v3238_v3 }
  0xdc   :  { %2300 = vmatprep.subr.bf16.mxu0 %v3238_v3 }
  0xdd   :  { %1789 = vmatmul.mubr.f32.vlgmr.msra.gmra.mrb[0].mxu1 %v2674_v40 }
  0xde   :  { %2158 = vmatpush3.bf16.msra.mxu1 %v3284_v22  ;;  %1999 = vmatmul.mubr.f32.vlgmr.msra.gmra.mrb[0].mxu0 %v2670_v27 }
  0xdf   :  { %2302 = vmatpush3.bf16.msra.mxu0 %v3286_v0  ;;  %2159 = vmatprep.subr.bf16.mxu1 %v3238_v3 }
  0xe0   :  { %2303 = vmatprep.subr.bf16.mxu0 %v3238_v3  ;;  %1823 = vmatprep.mubr.msk.f32.mxu1 %vm2454_vm0, %v3281_v37 }
  0xe1   :  { %2033 = vmatprep.mubr.msk.f32.mxu0 %vm2454_vm0, %v3281_v37 }
  0xe2   :  { %2161 = vmatpush3.bf16.msra.mxu1 %v3287_v30 }
  0xe3   :  { %2305 = vmatpush3.bf16.msra.mxu0 %v3288_v32  ;;  %2162 = vmatprep.subr.bf16.mxu1 %v3238_v3 }
  0xe4   :  { %2306 = vmatprep.subr.bf16.mxu0 %v3238_v3 }
  0xe6   :  { %2164 = vmatpush3.bf16.msra.mxu1 %v3289_v33 }
  0xe7   :  { %2308 = vmatpush3.bf16.msra.mxu0 %v3290_v45  ;;  %2165 = vmatprep.subr.bf16.mxu1 %v3238_v3 }
  0xe8   :  { %2309 = vmatprep.subr.bf16.mxu0 %v3238_v3 }
  0xea   :  { %2167 = vmatpush3.bf16.msra.mxu1 %v3291_v46 }
  0xeb   :  { %2311 = vmatpush3.bf16.msra.mxu0 %v3292_v58  ;;  %2168 = vmatprep.subr.bf16.mxu1 %v3238_v3 }
  0xec   :  { %2312 = vmatprep.subr.bf16.mxu0 %v3238_v3 }
  0xee   :  { %2170 = vmatpush3.bf16.msra.mxu1 %v3293_v62 }
  0xef   :  { %2314 = vmatpush3.bf16.msra.mxu0 %v3294_v59  ;;  %2171 = vmatprep.subr.bf16.mxu1 %v3238_v3 }
  0xf0   :  { %2315 = vmatprep.subr.bf16.mxu0 %v3238_v3 }
  0xf2   :  { %2173 = vmatpush3.bf16.msra.mxu1 %v3295_v7 }
  0xf3   :  { %2317 = vmatpush3.bf16.msra.mxu0 %v3296_v10  ;;  %2174 = vmatprep.subr.bf16.mxu1 %v3238_v3 }
  0xf4   :  { %2318 = vmatprep.subr.bf16.mxu0 %v3238_v3 }
  0xf6   :  { %2176 = vmatpush3.bf16.msra.mxu1 %v3297_v8 }
  0xf7   :  { %2320 = vmatpush3.bf16.msra.mxu0 %v3298_v15  ;;  %2177 = vmatprep.subr.bf16.mxu1 %v3238_v3 }
  0xf8   :  { %2321 = vmatprep.subr.bf16.mxu0 %v3238_v3 }
  0xfa   :  { %2179 = vmatpush3.bf16.msra.mxu1 %v3299_v11 }
  0xfb   :  { %2323 = vmatpush3.bf16.msra.mxu0 %v3300_v31 }
  0xfd   :  { %1824 = vmatmul.mubr.f32.vlgmr.msra.gmra.mrb[0].mxu1 %v2674_v40 }
  0xfe   :  { %2034 = vmatmul.mubr.f32.vlgmr.msra.gmra.mrb[0].mxu0 %v2670_v27 }
 0x1d0   :  { %v750_v54 = vpop.f32.mrb[0].mxu1 }
 0x1d1   :  { %v1391_v52 = vpop.f32.mrb[0].mxu0  ;;  %v1825_v26 = vpop.f32.mrb[1].mxu1 }
 0x1d2   :  { %v2324_v57 = vadd.f32 %v1391_v52, %v750_v54  ;;  %v2035_v44 = vpop.f32.mrb[1].mxu0 }
 0x1d4   :  { %1395 = vst [vmem:[#allocation8] sm:$0xff] %v2324_v57 }
 0x1d5   :  { %2431 = shalt.err (!%p2428_p0)
}
 0x1d6   :  { %s2432_s25 = scalar_lea.hbm %s3144_s3, 128 }
 0x1d7   :  { %p2433_p1 = scmp.ne.s32.totalorder %s3144_s3, %s2432_s25  ;;  %p2436_p2 = scmp.lt.u32.totalorder %s2432_s25, %s3144_s3 }
 0x1d9   :  { %p2438_p3 = pnand %p2436_p2, %p2433_p1 }
 0x1db   :  { %2441 = shalt.err (!%p2438_p3)
}
 0x1dc   :  { %1405 = dma.vmem_to_hbm [thread:$0]  %s1403_s21, 128, %s3144_s3, [#allocation4]  }
 0x1dd   :  { %2446 = dma.done.wait [#allocation4], 128  }
 0x1de   :  { %2447 = vsyncadd [#allocation4], 4294967168 }
 0x1df   :  { %1409 = vsyncpa [#allocation3], 1 }
 0x1e0   :  { %1410 = vsyncpa [#allocation6], 1 }
 0x1e1   :  { %1411 = vsyncpa [#allocation4], 1 }

</bundles_post_ra>
